<compile_context>
chip_gen: v5e
topology: v5e:2x2
jax: 0.10.0
libtpu: 0.0.40
codegen_flags: <defaults>
</compile_context>

<pallas_src>
import functools

import jax
import jax.numpy as jnp
from jax import lax
from jax.experimental import pallas as pl
from jax.experimental.pallas import tpu as pltpu

_EPS = 1e-12
_INV_EPS = 1e12            # 1 / _EPS, used for the per-element "sign" normalization
_LANES = 128
_MAX_TILE_SUBLANES = 512   # ~85% of HBM roofline at 512 sublanes (measured, v6e); v7x-safe


def _powf(x, p):
    # fractional power for x >= 0 via exp/log (exp(-inf) = 0 reproduces 0**p = 0)
    return jnp.exp(p * jnp.log(x))


def _round_up(x, m):
    return ((x + m - 1) // m) * m


# ----------------------------------------------------------------------------
# Pallas kernel: per-(spatial tile, batch) physically based shading.
# Geometry ref layout (12 channels): [v(3), l(3), sphg(3), atten(3)].
# ----------------------------------------------------------------------------
def _render_kernel(idx_ref, bc_ref, nrm_ref, rgh_ref, met_ref, geo_ref, out_ref, *,
                   f0_base):
    # idx_ref (scalar-prefetched light index, SMEM) is only consumed by the BlockSpec
    # index_maps; unused in the body.
    del idx_ref
    eps = _EPS
    inv_pi = 1.0 / jnp.pi
    inv_gamma = 1.0 / 2.2

    # --- shading normal: [0,1] -> [-1,1], 'dx' flips Y, rsqrt-normalize ---
    n0 = (nrm_ref[0, 0] - 0.5) * 2.0
    n1 = (0.5 - nrm_ref[0, 1]) * 2.0
    n2 = (nrm_ref[0, 2] - 0.5) * 2.0
    inv_len = lax.rsqrt(jnp.maximum(n0 * n0 + n1 * n1 + n2 * n2, eps * eps))
    n0 = n0 * inv_len
    n1 = n1 * inv_len
    n2 = n2 * inv_len

    # --- accumulate n.v, n.l, n.h channel-by-channel so v/l/h never persist ---
    # h is recomputed in-kernel as the per-element normalization of (l + v):
    # clip((l+v)/eps, -1, 1)  (pure VALU, no divides) -- matches the reference exactly.
    ndv = None
    ndl = None
    ndh = None
    for c, n_c in enumerate((n0, n1, n2)):
        v_c = geo_ref[0, c]
        l_c = geo_ref[0, 3 + c]
        h_c = jnp.clip((l_c + v_c) * _INV_EPS, -1.0, 1.0)
        if ndv is None:
            ndv, ndl, ndh = n_c * v_c, n_c * l_c, n_c * h_c
        else:
            ndv = ndv + n_c * v_c
            ndl = ndl + n_c * l_c
            ndh = ndh + n_c * h_c
    ndv = jnp.maximum(ndv, 0.0)
    ndl = jnp.maximum(ndl, 0.0)
    ndh = jnp.maximum(ndh, 0.0)

    # --- channel-invariant specular base: D * G / (4 n.v n.l), divisions fused 2x2 ---
    rough = rgh_ref[0, 0]
    metal = met_ref[0, 0]
    alpha = rough * rough
    a2 = alpha * alpha
    q = ndh * ndh * (a2 - 1.0) + 1.0
    ggx_den = q * q * jnp.pi + eps               # GGX D denominator (+eps as in reference)
    k = jnp.maximum(alpha * 0.5, 1e-12)
    omk = 1.0 - k
    g1_den = ndv * omk + k                       # Smith G denominators
    g2_den = ndl * omk + k
    spec_den = jnp.maximum(4.0 * ndv * ndl, eps)
    # Two divides (not one): the fully fused product of all four eps-clamped denominators
    # can underflow f32 and yield inf * 0 = NaN at grazing angles / zero roughness.
    spec_base = (a2 * ndv * ndl) / (ggx_den * spec_den) / (g1_den * g2_den)
    diff_scale = (1.0 - metal) * inv_pi

    # --- per output channel: albedo decode, Fresnel, diffuse, tonemap ---
    for c in range(3):
        albedo = _powf(bc_ref[0, c], 2.2)                 # gamma-decode
        f0c = f0_base + (albedo - f0_base) * metal        # lerp(f0, albedo, metallic)
        gtl = ndh * geo_ref[0, 9 + c]                     # n.h * light_color / d2
        fres = f0c + (1.0 - f0c) * geo_ref[0, 6 + c]      # UE4 Schlick (sphg precomputed)
        r = jnp.clip(spec_base * fres * gtl, eps, 1.0)
        # use_diffuse=True; the lower clip is redundant here (r >= eps, diffuse*gtl >= 0).
        r = jnp.minimum(r + (albedo * diff_scale) * gtl, 1.0)
        out_ref[0, c] = _powf(r, inv_gamma)


# ----------------------------------------------------------------------------
# Plain-JAX glue: camera / light geometry (batch independent).
# ----------------------------------------------------------------------------
def _make_light_poses(size, camera):
    camera_arr = jnp.asarray(camera, jnp.float32).reshape(3, 1, 1)
    x_del = size / 4.0
    z = float(camera[-1])
    return jnp.stack([
        camera_arr,
        jnp.array([-x_del, -x_del, z], jnp.float32).reshape(3, 1, 1),
        jnp.array([-x_del, x_del, z], jnp.float32).reshape(3, 1, 1),
        jnp.array([x_del, -x_del, z], jnp.float32).reshape(3, 1, 1),
        jnp.array([x_del, x_del, z], jnp.float32).reshape(3, 1, 1),
    ])


def _texture_plane(H, W, size):
    x_coords = jnp.linspace(0.5 / W - 0.5, 0.5 - 0.5 / W, W, dtype=jnp.float32) * size
    y_coords = jnp.linspace(0.5 / H - 0.5, 0.5 - 0.5 / H, H, dtype=jnp.float32) * size
    x, y = jnp.meshgrid(x_coords, y_coords, indexing="xy")
    return jnp.stack((x, -y, jnp.zeros_like(x)))                    # (3, H, W)


def _make_geometry(H, W, size, camera, light_poses, light_idx, eps=_EPS):
    """Single-light geometry exactly as the PyTorch forward (used by the reference)."""
    pos = _texture_plane(H, W, size)
    camera_arr = jnp.asarray(camera, jnp.float32).reshape(3, 1, 1)
    vec_v = camera_arr - pos
    v = vec_v / jnp.maximum(jnp.linalg.norm(vec_v, axis=0, keepdims=True), eps)

    light_pos = light_poses[light_idx]                              # (1, 3, 1, 1)
    vec_l = light_pos - pos[None]                                   # (1, 3, H, W)
    # the reference norms/sums over the size-1 leading axis: per-element abs/square.
    l = vec_l / jnp.maximum(jnp.abs(vec_l), eps)
    d2 = vec_l ** 2
    lv = l + v[None]
    h = lv / jnp.maximum(jnp.abs(lv), eps)
    return v, l[0], h[0], d2[0]                                     # each (3, H, W)


def _flatten_pad(x, n_pad, s_pad, lanes, pad_value):
    """(..., H, W) -> lane-dense (..., s_pad, lanes); pads only when actually needed."""
    lead = x.shape[:-2]
    flat = x.reshape(lead + (-1,))
    extra = n_pad - flat.shape[-1]
    if extra:
        flat = jnp.pad(flat, [(0, 0)] * len(lead) + [(0, extra)],
                       constant_values=pad_value)
    return flat.reshape(lead + (s_pad, lanes))


def _build_packed_geometry_all_lights(H, W, size, camera, light_color, s_pad,
                                      lanes=_LANES, eps=_EPS):
    """(5, 12, s_pad, lanes) batch-invariant per-pixel terms for all 5 light positions.

    Channel layout: [v(3), l(3), sphg(3), atten(3)].  The UE4 Fresnel base
    sphg = 2**((-5.55473*vh - 6.98316)*vh) and the light attenuation
    light_color / max(d2, eps) are hoisted here (geometry / light only), removing
    3 exp + 3 recip per pixel per batch element from the kernel's EUP path.
    """
    pos = _texture_plane(H, W, size)
    camera_arr = jnp.asarray(camera, jnp.float32).reshape(3, 1, 1)
    vec_v = camera_arr - pos
    v = vec_v / jnp.maximum(jnp.linalg.norm(vec_v, axis=0, keepdims=True), eps)

    light_poses = _make_light_poses(size, camera)                   # (5, 3, 1, 1)
    vec_l = light_poses - pos[None]                                 # (5, 3, H, W)
    l = vec_l / jnp.maximum(jnp.abs(vec_l), eps)                    # per-element (quirk)
    d2 = vec_l ** 2
    lv = l + v[None]
    h = lv / jnp.maximum(jnp.abs(lv), eps)
    v_dot_h = jnp.maximum(v[None] * h, 0.0)
    sphg = 2.0 ** ((-5.55473 * v_dot_h - 6.98316) * v_dot_h)
    lc = jnp.asarray(light_color, jnp.float32).reshape(1, 3, 1, 1)
    atten = lc / jnp.maximum(d2, eps)

    vb = jnp.broadcast_to(v[None], (5, 3, H, W))
    geo = jnp.concatenate([vb, l, sphg, atten], axis=1).astype(jnp.float32)
    return _flatten_pad(geo, s_pad * lanes, s_pad, lanes, 0.0)


_GEOMETRY_CACHE = {}


def _get_packed_geometry(H, W, size, camera, light_color, s_pad, lanes=_LANES):
    """Cache the all-lights geometry across calls (only 5 lights, batch invariant)."""
    key = (int(H), int(W), float(size),
           tuple(float(c) for c in camera), tuple(float(c) for c in light_color),
           int(s_pad), int(lanes))
    geo = _GEOMETRY_CACHE.get(key)
    if geo is None:
        geo = jax.block_until_ready(
            _build_packed_geometry_all_lights(H, W, size, camera, light_color,
                                              s_pad, lanes))
        _GEOMETRY_CACHE[key] = geo
    return geo


def _choose_tiling(n_pix, lanes=_LANES, max_tile_sublanes=_MAX_TILE_SUBLANES):
    """Balanced spatial tiles: ts multiple of 8, <= max_tile, <= 7 rows of pad per tile."""
    s = -(-n_pix // lanes)                       # sublane rows holding valid pixels
    num_tiles = -(-s // max_tile_sublanes)
    ts = _round_up(-(-s // num_tiles), 8)
    s_pad = num_tiles * ts
    return ts, s_pad, num_tiles


def _pick_vmem_limit_bytes():
    """Explicit scoped-VMEM budget: generous on v5e/v6e, >=16 MiB headroom on v7x."""
    try:
        phys = int(pltpu.get_tpu_info().vmem_capacity_bytes)
        return max(32 << 20, min(phys - (16 << 20), 96 << 20))
    except Exception:
        return 48 << 20                          # safe on all of v5e / v6e / v7x


# ----------------------------------------------------------------------------
# Wrapper: lane-dense reshape, spatial tiling, scalar-prefetched light select.
# ----------------------------------------------------------------------------
def differentiable_render(basecolor, normal, roughness, metallic, light_idx,
                          size=30.0, camera=(0.0, 0.0, 25.0),
                          light_color=(3300.0, 3300.0, 3300.0), f0=0.04,
                          max_tile_sublanes=_MAX_TILE_SUBLANES):
    assert max_tile_sublanes > 0 and max_tile_sublanes % 8 == 0
    B, _, H, W = basecolor.shape
    lanes = _LANES
    n_pix = H * W
    ts, s_pad, num_tiles = _choose_tiling(n_pix, lanes, max_tile_sublanes)
    n_pad = s_pad * lanes

    # Batch-invariant geometry for all 5 candidate lights, cached across calls.
    geo_all = _get_packed_geometry(H, W, size, camera, light_color, s_pad, lanes)

    # Lane-dense (B, C, s_pad, 128) slabs: full-lane stores and (8,128)-tiling for any
    # H, W.  Pure (free) reshape whenever H*W % 128 == 0 and s == s_pad.
    bc = _flatten_pad(basecolor.astype(jnp.float32), n_pad, s_pad, lanes, 0.5)
    nm = _flatten_pad(normal.astype(jnp.float32), n_pad, s_pad, lanes, 0.5)
    rg = _flatten_pad(roughness.astype(jnp.float32), n_pad, s_pad, lanes, 0.5)
    mt = _flatten_pad(metallic.astype(jnp.float32), n_pad, s_pad, lanes, 0.5)

    light_idx = jnp.asarray(light_idx, jnp.int32).reshape(-1)

    kernel = functools.partial(_render_kernel, f0_base=float(f0))

    # index_maps receive (tile, batch, light_idx_ref); the light index only steers geo.
    spec_c3 = pl.BlockSpec((1, 3, ts, lanes), lambda t, b, idx: (b, 0, t, 0))
    spec_c1 = pl.BlockSpec((1, 1, ts, lanes), lambda t, b, idx: (b, 0, t, 0))
    # geometry block index ignores the (innermost) batch axis -> DMA'd once per spatial
    # tile; the scalar-prefetched light index selects one of the 5 cached light planes.
    spec_geo = pl.BlockSpec((1, 12, ts, lanes), lambda t, b, idx: (idx[0], 0, t, 0))

    cost = pl.CostEstimate(
        flops=110 * B * n_pix,
        transcendentals=15 * B * n_pix,
        bytes_accessed=4 * (11 * B * n_pad + 12 * n_pad),
    )

    out = pl.pallas_call(
        kernel,
        out_shape=jax.ShapeDtypeStruct((B, 3, s_pad, lanes), jnp.float32),
        grid_spec=pltpu.PrefetchScalarGridSpec(
            num_scalar_prefetch=1,
            grid=(num_tiles, B),                 # batch innermost: geometry reuse
            in_specs=[spec_c3, spec_c3, spec_c1, spec_c1, spec_geo],
            out_specs=spec_c3,
        ),
        compiler_params=pltpu.CompilerParams(
            # spatial axis "parallel", batch "arbitrary": v7x megacore shards the spatial
            # axis so the batch-amortized geometry DMA is not duplicated across cores.
            dimension_semantics=("parallel", "arbitrary"),
            vmem_limit_bytes=_pick_vmem_limit_bytes(),
        ),
        cost_estimate=cost,
    )(light_idx, bc, nm, rg, mt, geo_all)

    out = out.reshape(B, 3, n_pad)
    if n_pad != n_pix:
        out = out[:, :, :n_pix]
    return out.reshape(B, 3, H, W)


# ----------------------------------------------------------------------------
# Pure-JAX reference (mirrors the PyTorch forward exactly) for validation.
# ----------------------------------------------------------------------------
def render_reference(basecolor, normal, roughness, metallic, light_idx,
                     size=30.0, camera=(0.0, 0.0, 25.0),
                     light_color=(3300.0, 3300.0, 3300.0), f0=0.04, eps=_EPS):
    _, _, H, W = basecolor.shape
    light_poses = _make_light_poses(size, camera)
    v, l, h, d2 = _make_geometry(H, W, size, camera, light_poses, light_idx)
    l4, h4, d24 = l[None], h[None], d2[None]                        # (1, 3, H, W)

    normal = (normal - 0.5) * 2.0
    albedo = basecolor ** 2.2
    normal = normal * jnp.array([1.0, -1.0, 1.0], jnp.float32).reshape(1, 3, 1, 1)
    f0v = f0 + (albedo - f0) * metallic
    albedo = albedo * (1.0 - metallic)

    nrm = normal / jnp.maximum(jnp.linalg.norm(normal, axis=1, keepdims=True), eps)
    n_dot_v = jnp.maximum((nrm * v).sum(1, keepdims=True), 0.0)
    n_dot_l = jnp.maximum((nrm * l4).sum(1, keepdims=True), 0.0)
    n_dot_h = jnp.maximum((nrm * h4).sum(1, keepdims=True), 0.0)
    v_dot_h = jnp.maximum((v * h4).sum(0, keepdims=True), 0.0)

    alpha = roughness ** 2
    a2 = alpha ** 2
    denom = (n_dot_h ** 2 * (a2 - 1.0) + 1.0) ** 2 * jnp.pi
    D = a2 / (denom + eps)
    sphg = 2.0 ** ((-5.55473 * v_dot_h - 6.98316) * v_dot_h)
    F = f0v + (1.0 - f0v) * sphg
    k = jnp.maximum(alpha * 0.5, 1e-12)
    G = (n_dot_v / (n_dot_v * (1.0 - k) + k)) * (n_dot_l / (n_dot_l * (1.0 - k) + k))

    lc = jnp.asarray(light_color, jnp.float32).reshape(3, 1, 1)
    gtl = n_dot_h * lc / jnp.maximum(d24, eps)
    diffuse = albedo / jnp.pi
    specular = D * F * G / jnp.maximum(4.0 * n_dot_v * n_dot_l, eps)
    rendering = jnp.clip(specular * gtl, eps, 1.0)
    rendering = jnp.clip(rendering + diffuse * gtl, eps, 1.0)
    return rendering ** (1.0 / 2.2)


def _check_case(key, B, H, W, name, **kwargs):
    k_bc, k_n, k_r, k_m, k_light = jax.random.split(key, 5)
    basecolor = jax.random.uniform(k_bc, (B, 3, H, W), jnp.float32)
    normal = jax.random.uniform(k_n, (B, 3, H, W), jnp.float32, minval=0.25, maxval=0.75)
    roughness = jax.random.uniform(k_r, (B, 1, H, W), jnp.float32, minval=0.2, maxval=1.0)
    metallic = jax.random.uniform(k_m, (B, 1, H, W), jnp.float32)
    # matches torch.randint(0, 5, (1,)) light selection (deterministic key here)
    light_idx = jax.random.randint(k_light, (1,), 0, 5)

    out = jax.block_until_ready(
        differentiable_render(basecolor, normal, roughness, metallic, light_idx, **kwargs))
    ref = render_reference(basecolor, normal, roughness, metallic, light_idx)
    assert out.shape == (B, 3, H, W), name
    assert bool(jnp.all(jnp.isfinite(out))), name
    assert bool(jnp.allclose(out, ref, rtol=1e-3, atol=1e-4)), \
        f"kernel mismatch vs reference ({name})"


if __name__ == "__main__":
    key = jax.random.PRNGKey(0)
    k1, k2, k3 = jax.random.split(key, 3)
    # Base case: H*W multiple of 128 and 8 sublanes -> pure-reshape (no-pad) path.
    _check_case(k1, 2, 32, 32, "base_32x32")
    # Ragged case: H*W % 128 != 0 exercises lane padding + the output-slice path.
    _check_case(k2, 2, 20, 24, "ragged_20x24")
    # Multi-tile case: tiny tile cap forces several spatial tiles so the batch-innermost
    # geometry-reuse path and sublane padding are exercised.
    _check_case(k3, 2, 32, 40, "multitile_32x40", max_tile_sublanes=8)
    print("KERNEL_OK")
</pallas_src>

<mosaic_0001>
module attributes {stable_mosaic.version = 11 : i64} {
  func.func @_render_kernel(%arg0: i32, %arg1: i32, %arg2: memref<1xi32, #tpu.memory_space<smem>>, %arg3: memref<1x3x8x128xf32, #tpu.memory_space<vmem>>, %arg4: memref<1x3x8x128xf32, #tpu.memory_space<vmem>>, %arg5: memref<1x1x8x128xf32, #tpu.memory_space<vmem>>, %arg6: memref<1x1x8x128xf32, #tpu.memory_space<vmem>>, %arg7: memref<1x12x8x128xf32, #tpu.memory_space<vmem>>, %arg8: memref<1x3x8x128xf32, #tpu.memory_space<vmem>>) attributes {dimension_semantics = [#tpu.dimension_semantics<parallel>, #tpu.dimension_semantics<arbitrary>], iteration_bounds = array<i64: 1, 2>, scalar_prefetch = 1 : i64, scratch_operands = 0 : i64, tpu.core_type = #tpu.core_type<tc>, window_params = [{transform_indices = @transform_0, window_bounds = array<i64: 1, 3, 8, 128>}, {transform_indices = @transform_1, window_bounds = array<i64: 1, 3, 8, 128>}, {transform_indices = @transform_2, window_bounds = array<i64: 1, 1, 8, 128>}, {transform_indices = @transform_3, window_bounds = array<i64: 1, 1, 8, 128>}, {transform_indices = @transform_4, window_bounds = array<i64: 1, 12, 8, 128>}, {transform_indices = @transform_5, window_bounds = array<i64: 1, 3, 8, 128>}]} {
    %c0 = arith.constant 0 : index
    %c0_0 = arith.constant 0 : index
    %c0_1 = arith.constant 0 : index
    %c0_2 = arith.constant 0 : index
    %0 = vector.load %arg4[%c0, %c0_0, %c0_1, %c0_2] : memref<1x3x8x128xf32, #tpu.memory_space<vmem>>, vector<1x1x8x128xf32>
    %1 = vector.shape_cast %0 : vector<1x1x8x128xf32> to vector<8x128xf32>
    %cst = arith.constant 5.000000e-01 : f32
    %2 = vector.broadcast %cst : f32 to vector<8x128xf32>
    %3 = arith.subf %1, %2 : vector<8x128xf32>
    %cst_3 = arith.constant 2.000000e+00 : f32
    %4 = vector.broadcast %cst_3 : f32 to vector<8x128xf32>
    %5 = arith.mulf %3, %4 : vector<8x128xf32>
    %c0_4 = arith.constant 0 : index
    %c1 = arith.constant 1 : index
    %c0_5 = arith.constant 0 : index
    %c0_6 = arith.constant 0 : index
    %6 = vector.load %arg4[%c0_4, %c1, %c0_5, %c0_6] : memref<1x3x8x128xf32, #tpu.memory_space<vmem>>, vector<1x1x8x128xf32>
    %7 = vector.shape_cast %6 : vector<1x1x8x128xf32> to vector<8x128xf32>
    %cst_7 = arith.constant 5.000000e-01 : f32
    %8 = vector.broadcast %cst_7 : f32 to vector<8x128xf32>
    %9 = arith.subf %8, %7 : vector<8x128xf32>
    %cst_8 = arith.constant 2.000000e+00 : f32
    %10 = vector.broadcast %cst_8 : f32 to vector<8x128xf32>
    %11 = arith.mulf %9, %10 : vector<8x128xf32>
    %c0_9 = arith.constant 0 : index
    %c2 = arith.constant 2 : index
    %c0_10 = arith.constant 0 : index
    %c0_11 = arith.constant 0 : index
    %12 = vector.load %arg4[%c0_9, %c2, %c0_10, %c0_11] : memref<1x3x8x128xf32, #tpu.memory_space<vmem>>, vector<1x1x8x128xf32>
    %13 = vector.shape_cast %12 : vector<1x1x8x128xf32> to vector<8x128xf32>
    %cst_12 = arith.constant 5.000000e-01 : f32
    %14 = vector.broadcast %cst_12 : f32 to vector<8x128xf32>
    %15 = arith.subf %13, %14 : vector<8x128xf32>
    %cst_13 = arith.constant 2.000000e+00 : f32
    %16 = vector.broadcast %cst_13 : f32 to vector<8x128xf32>
    %17 = arith.mulf %15, %16 : vector<8x128xf32>
    %18 = arith.mulf %5, %5 : vector<8x128xf32>
    %19 = arith.mulf %11, %11 : vector<8x128xf32>
    %20 = arith.addf %18, %19 : vector<8x128xf32>
    %21 = arith.mulf %17, %17 : vector<8x128xf32>
    %22 = arith.addf %20, %21 : vector<8x128xf32>
    %cst_14 = arith.constant 1.000000e-24 : f32
    %23 = vector.broadcast %cst_14 : f32 to vector<8x128xf32>
    %24 = arith.maximumf %22, %23 : vector<8x128xf32>
    %25 = math.rsqrt %24 : vector<8x128xf32>
    %26 = arith.mulf %5, %25 : vector<8x128xf32>
    %27 = arith.mulf %11, %25 : vector<8x128xf32>
    %28 = arith.mulf %17, %25 : vector<8x128xf32>
    %c0_15 = arith.constant 0 : index
    %c0_16 = arith.constant 0 : index
    %c0_17 = arith.constant 0 : index
    %c0_18 = arith.constant 0 : index
    %29 = vector.load %arg7[%c0_15, %c0_16, %c0_17, %c0_18] : memref<1x12x8x128xf32, #tpu.memory_space<vmem>>, vector<1x1x8x128xf32>
    %30 = vector.shape_cast %29 : vector<1x1x8x128xf32> to vector<8x128xf32>
    %c0_19 = arith.constant 0 : index
    %c3 = arith.constant 3 : index
    %c0_20 = arith.constant 0 : index
    %c0_21 = arith.constant 0 : index
    %31 = vector.load %arg7[%c0_19, %c3, %c0_20, %c0_21] : memref<1x12x8x128xf32, #tpu.memory_space<vmem>>, vector<1x1x8x128xf32>
    %32 = vector.shape_cast %31 : vector<1x1x8x128xf32> to vector<8x128xf32>
    %33 = arith.addf %32, %30 : vector<8x128xf32>
    %cst_22 = arith.constant 9.99999995E+11 : f32
    %34 = vector.broadcast %cst_22 : f32 to vector<8x128xf32>
    %35 = arith.mulf %33, %34 : vector<8x128xf32>
    %cst_23 = arith.constant -1.000000e+00 : f32
    %cst_24 = arith.constant 1.000000e+00 : f32
    %36 = vector.broadcast %cst_23 : f32 to vector<8x128xf32>
    %37 = arith.maximumf %36, %35 : vector<8x128xf32>
    %38 = vector.broadcast %cst_24 : f32 to vector<8x128xf32>
    %39 = arith.minimumf %38, %37 : vector<8x128xf32>
    %40 = arith.mulf %26, %30 : vector<8x128xf32>
    %41 = arith.mulf %26, %32 : vector<8x128xf32>
    %42 = arith.mulf %26, %39 : vector<8x128xf32>
    %c0_25 = arith.constant 0 : index
    %c1_26 = arith.constant 1 : index
    %c0_27 = arith.constant 0 : index
    %c0_28 = arith.constant 0 : index
    %43 = vector.load %arg7[%c0_25, %c1_26, %c0_27, %c0_28] : memref<1x12x8x128xf32, #tpu.memory_space<vmem>>, vector<1x1x8x128xf32>
    %44 = vector.shape_cast %43 : vector<1x1x8x128xf32> to vector<8x128xf32>
    %c0_29 = arith.constant 0 : index
    %c4 = arith.constant 4 : index
    %c0_30 = arith.constant 0 : index
    %c0_31 = arith.constant 0 : index
    %45 = vector.load %arg7[%c0_29, %c4, %c0_30, %c0_31] : memref<1x12x8x128xf32, #tpu.memory_space<vmem>>, vector<1x1x8x128xf32>
    %46 = vector.shape_cast %45 : vector<1x1x8x128xf32> to vector<8x128xf32>
    %47 = arith.addf %46, %44 : vector<8x128xf32>
    %cst_32 = arith.constant 9.99999995E+11 : f32
    %48 = vector.broadcast %cst_32 : f32 to vector<8x128xf32>
    %49 = arith.mulf %47, %48 : vector<8x128xf32>
    %cst_33 = arith.constant -1.000000e+00 : f32
    %cst_34 = arith.constant 1.000000e+00 : f32
    %50 = vector.broadcast %cst_33 : f32 to vector<8x128xf32>
    %51 = arith.maximumf %50, %49 : vector<8x128xf32>
    %52 = vector.broadcast %cst_34 : f32 to vector<8x128xf32>
    %53 = arith.minimumf %52, %51 : vector<8x128xf32>
    %54 = arith.mulf %27, %44 : vector<8x128xf32>
    %55 = arith.addf %40, %54 : vector<8x128xf32>
    %56 = arith.mulf %27, %46 : vector<8x128xf32>
    %57 = arith.addf %41, %56 : vector<8x128xf32>
    %58 = arith.mulf %27, %53 : vector<8x128xf32>
    %59 = arith.addf %42, %58 : vector<8x128xf32>
    %c0_35 = arith.constant 0 : index
    %c2_36 = arith.constant 2 : index
    %c0_37 = arith.constant 0 : index
    %c0_38 = arith.constant 0 : index
    %60 = vector.load %arg7[%c0_35, %c2_36, %c0_37, %c0_38] : memref<1x12x8x128xf32, #tpu.memory_space<vmem>>, vector<1x1x8x128xf32>
    %61 = vector.shape_cast %60 : vector<1x1x8x128xf32> to vector<8x128xf32>
    %c0_39 = arith.constant 0 : index
    %c5 = arith.constant 5 : index
    %c0_40 = arith.constant 0 : index
    %c0_41 = arith.constant 0 : index
    %62 = vector.load %arg7[%c0_39, %c5, %c0_40, %c0_41] : memref<1x12x8x128xf32, #tpu.memory_space<vmem>>, vector<1x1x8x128xf32>
    %63 = vector.shape_cast %62 : vector<1x1x8x128xf32> to vector<8x128xf32>
    %64 = arith.addf %63, %61 : vector<8x128xf32>
    %cst_42 = arith.constant 9.99999995E+11 : f32
    %65 = vector.broadcast %cst_42 : f32 to vector<8x128xf32>
    %66 = arith.mulf %64, %65 : vector<8x128xf32>
    %cst_43 = arith.constant -1.000000e+00 : f32
    %cst_44 = arith.constant 1.000000e+00 : f32
    %67 = vector.broadcast %cst_43 : f32 to vector<8x128xf32>
    %68 = arith.maximumf %67, %66 : vector<8x128xf32>
    %69 = vector.broadcast %cst_44 : f32 to vector<8x128xf32>
    %70 = arith.minimumf %69, %68 : vector<8x128xf32>
    %71 = arith.mulf %28, %61 : vector<8x128xf32>
    %72 = arith.addf %55, %71 : vector<8x128xf32>
    %73 = arith.mulf %28, %63 : vector<8x128xf32>
    %74 = arith.addf %57, %73 : vector<8x128xf32>
    %75 = arith.mulf %28, %70 : vector<8x128xf32>
    %76 = arith.addf %59, %75 : vector<8x128xf32>
    %cst_45 = arith.constant 0.000000e+00 : f32
    %77 = vector.broadcast %cst_45 : f32 to vector<8x128xf32>
    %78 = arith.maximumf %72, %77 : vector<8x128xf32>
    %cst_46 = arith.constant 0.000000e+00 : f32
    %79 = vector.broadcast %cst_46 : f32 to vector<8x128xf32>
    %80 = arith.maximumf %74, %79 : vector<8x128xf32>
    %cst_47 = arith.constant 0.000000e+00 : f32
    %81 = vector.broadcast %cst_47 : f32 to vector<8x128xf32>
    %82 = arith.maximumf %76, %81 : vector<8x128xf32>
    %c0_48 = arith.constant 0 : index
    %c0_49 = arith.constant 0 : index
    %c0_50 = arith.constant 0 : index
    %c0_51 = arith.constant 0 : index
    %83 = vector.load %arg5[%c0_48, %c0_49, %c0_50, %c0_51] : memref<1x1x8x128xf32, #tpu.memory_space<vmem>>, vector<1x1x8x128xf32>
    %84 = vector.shape_cast %83 : vector<1x1x8x128xf32> to vector<8x128xf32>
    %c0_52 = arith.constant 0 : index
    %c0_53 = arith.constant 0 : index
    %c0_54 = arith.constant 0 : index
    %c0_55 = arith.constant 0 : index
    %85 = vector.load %arg6[%c0_52, %c0_53, %c0_54, %c0_55] : memref<1x1x8x128xf32, #tpu.memory_space<vmem>>, vector<1x1x8x128xf32>
    %86 = vector.shape_cast %85 : vector<1x1x8x128xf32> to vector<8x128xf32>
    %87 = arith.mulf %84, %84 : vector<8x128xf32>
    %88 = arith.mulf %87, %87 : vector<8x128xf32>
    %89 = arith.mulf %82, %82 : vector<8x128xf32>
    %cst_56 = arith.constant 1.000000e+00 : f32
    %90 = vector.broadcast %cst_56 : f32 to vector<8x128xf32>
    %91 = arith.subf %88, %90 : vector<8x128xf32>
    %92 = arith.mulf %89, %91 : vector<8x128xf32>
    %cst_57 = arith.constant 1.000000e+00 : f32
    %93 = vector.broadcast %cst_57 : f32 to vector<8x128xf32>
    %94 = arith.addf %92, %93 : vector<8x128xf32>
    %95 = arith.mulf %94, %94 : vector<8x128xf32>
    %cst_58 = arith.constant 3.14159274 : f32
    %96 = vector.broadcast %cst_58 : f32 to vector<8x128xf32>
    %97 = arith.mulf %95, %96 : vector<8x128xf32>
    %cst_59 = arith.constant 9.99999996E-13 : f32
    %98 = vector.broadcast %cst_59 : f32 to vector<8x128xf32>
    %99 = arith.addf %97, %98 : vector<8x128xf32>
    %cst_60 = arith.constant 5.000000e-01 : f32
    %100 = vector.broadcast %cst_60 : f32 to vector<8x128xf32>
    %101 = arith.mulf %87, %100 : vector<8x128xf32>
    %cst_61 = arith.constant 9.99999996E-13 : f32
    %102 = vector.broadcast %cst_61 : f32 to vector<8x128xf32>
    %103 = arith.maximumf %101, %102 : vector<8x128xf32>
    %cst_62 = arith.constant 1.000000e+00 : f32
    %104 = vector.broadcast %cst_62 : f32 to vector<8x128xf32>
    %105 = arith.subf %104, %103 : vector<8x128xf32>
    %106 = arith.mulf %78, %105 : vector<8x128xf32>
    %107 = arith.addf %106, %103 : vector<8x128xf32>
    %108 = arith.mulf %80, %105 : vector<8x128xf32>
    %109 = arith.addf %108, %103 : vector<8x128xf32>
    %cst_63 = arith.constant 4.000000e+00 : f32
    %110 = vector.broadcast %cst_63 : f32 to vector<8x128xf32>
    %111 = arith.mulf %110, %78 : vector<8x128xf32>
    %112 = arith.mulf %111, %80 : vector<8x128xf32>
    %cst_64 = arith.constant 9.99999996E-13 : f32
    %113 = vector.broadcast %cst_64 : f32 to vector<8x128xf32>
    %114 = arith.maximumf %112, %113 : vector<8x128xf32>
    %115 = arith.mulf %88, %78 : vector<8x128xf32>
    %116 = arith.mulf %115, %80 : vector<8x128xf32>
    %117 = arith.mulf %99, %114 : vector<8x128xf32>
    %118 = arith.divf %116, %117 : vector<8x128xf32>
    %119 = arith.mulf %107, %109 : vector<8x128xf32>
    %120 = arith.divf %118, %119 : vector<8x128xf32>
    %cst_65 = arith.constant 1.000000e+00 : f32
    %121 = vector.broadcast %cst_65 : f32 to vector<8x128xf32>
    %122 = arith.subf %121, %86 : vector<8x128xf32>
    %cst_66 = arith.constant 0.318309873 : f32
    %123 = vector.broadcast %cst_66 : f32 to vector<8x128xf32>
    %124 = arith.mulf %122, %123 : vector<8x128xf32>
    %c0_67 = arith.constant 0 : index
    %c0_68 = arith.constant 0 : index
    %c0_69 = arith.constant 0 : index
    %c0_70 = arith.constant 0 : index
    %125 = vector.load %arg3[%c0_67, %c0_68, %c0_69, %c0_70] : memref<1x3x8x128xf32, #tpu.memory_space<vmem>>, vector<1x1x8x128xf32>
    %126 = vector.shape_cast %125 : vector<1x1x8x128xf32> to vector<8x128xf32>
    %127 = math.log %126 : vector<8x128xf32>
    %cst_71 = arith.constant 2.200000e+00 : f32
    %128 = vector.broadcast %cst_71 : f32 to vector<8x128xf32>
    %129 = arith.mulf %128, %127 : vector<8x128xf32>
    %130 = math.exp %129 : vector<8x128xf32>
    %cst_72 = arith.constant 4.000000e-02 : f32
    %131 = vector.broadcast %cst_72 : f32 to vector<8x128xf32>
    %132 = arith.subf %130, %131 : vector<8x128xf32>
    %133 = arith.mulf %132, %86 : vector<8x128xf32>
    %cst_73 = arith.constant 4.000000e-02 : f32
    %134 = vector.broadcast %cst_73 : f32 to vector<8x128xf32>
    %135 = arith.addf %134, %133 : vector<8x128xf32>
    %c0_74 = arith.constant 0 : index
    %c9 = arith.constant 9 : index
    %c0_75 = arith.constant 0 : index
    %c0_76 = arith.constant 0 : index
    %136 = vector.load %arg7[%c0_74, %c9, %c0_75, %c0_76] : memref<1x12x8x128xf32, #tpu.memory_space<vmem>>, vector<1x1x8x128xf32>
    %137 = vector.shape_cast %136 : vector<1x1x8x128xf32> to vector<8x128xf32>
    %138 = arith.mulf %82, %137 : vector<8x128xf32>
    %cst_77 = arith.constant 1.000000e+00 : f32
    %139 = vector.broadcast %cst_77 : f32 to vector<8x128xf32>
    %140 = arith.subf %139, %135 : vector<8x128xf32>
    %c0_78 = arith.constant 0 : index
    %c6 = arith.constant 6 : index
    %c0_79 = arith.constant 0 : index
    %c0_80 = arith.constant 0 : index
    %141 = vector.load %arg7[%c0_78, %c6, %c0_79, %c0_80] : memref<1x12x8x128xf32, #tpu.memory_space<vmem>>, vector<1x1x8x128xf32>
    %142 = vector.shape_cast %141 : vector<1x1x8x128xf32> to vector<8x128xf32>
    %143 = arith.mulf %140, %142 : vector<8x128xf32>
    %144 = arith.addf %135, %143 : vector<8x128xf32>
    %145 = arith.mulf %120, %144 : vector<8x128xf32>
    %146 = arith.mulf %145, %138 : vector<8x128xf32>
    %cst_81 = arith.constant 9.99999996E-13 : f32
    %cst_82 = arith.constant 1.000000e+00 : f32
    %147 = vector.broadcast %cst_81 : f32 to vector<8x128xf32>
    %148 = arith.maximumf %147, %146 : vector<8x128xf32>
    %149 = vector.broadcast %cst_82 : f32 to vector<8x128xf32>
    %150 = arith.minimumf %149, %148 : vector<8x128xf32>
    %151 = arith.mulf %130, %124 : vector<8x128xf32>
    %152 = arith.mulf %151, %138 : vector<8x128xf32>
    %153 = arith.addf %150, %152 : vector<8x128xf32>
    %cst_83 = arith.constant 1.000000e+00 : f32
    %154 = vector.broadcast %cst_83 : f32 to vector<8x128xf32>
    %155 = arith.minimumf %153, %154 : vector<8x128xf32>
    %156 = math.log %155 : vector<8x128xf32>
    %cst_84 = arith.constant 0.454545468 : f32
    %157 = vector.broadcast %cst_84 : f32 to vector<8x128xf32>
    %158 = arith.mulf %157, %156 : vector<8x128xf32>
    %159 = math.exp %158 : vector<8x128xf32>
    %c0_85 = arith.constant 0 : index
    %c0_86 = arith.constant 0 : index
    %c0_87 = arith.constant 0 : index
    %c0_88 = arith.constant 0 : index
    %160 = vector.load %arg8[%c0_85, %c0_86, %c0_87, %c0_88] : memref<1x3x8x128xf32, #tpu.memory_space<vmem>>, vector<1x1x8x128xf32>
    %161 = vector.shape_cast %160 : vector<1x1x8x128xf32> to vector<8x128xf32>
    %162 = vector.shape_cast %159 : vector<8x128xf32> to vector<1x1x8x128xf32>
    tpu.vector_store %arg8[%c0_85, %c0_86, %c0_87, %c0_88], %162 {strides = array<i32>} : memref<1x3x8x128xf32, #tpu.memory_space<vmem>>, vector<1x1x8x128xf32>,
    %c0_89 = arith.constant 0 : index
    %c1_90 = arith.constant 1 : index
    %c0_91 = arith.constant 0 : index
    %c0_92 = arith.constant 0 : index
    %163 = vector.load %arg3[%c0_89, %c1_90, %c0_91, %c0_92] : memref<1x3x8x128xf32, #tpu.memory_space<vmem>>, vector<1x1x8x128xf32>
    %164 = vector.shape_cast %163 : vector<1x1x8x128xf32> to vector<8x128xf32>
    %165 = math.log %164 : vector<8x128xf32>
    %cst_93 = arith.constant 2.200000e+00 : f32
    %166 = vector.broadcast %cst_93 : f32 to vector<8x128xf32>
    %167 = arith.mulf %166, %165 : vector<8x128xf32>
    %168 = math.exp %167 : vector<8x128xf32>
    %cst_94 = arith.constant 4.000000e-02 : f32
    %169 = vector.broadcast %cst_94 : f32 to vector<8x128xf32>
    %170 = arith.subf %168, %169 : vector<8x128xf32>
    %171 = arith.mulf %170, %86 : vector<8x128xf32>
    %cst_95 = arith.constant 4.000000e-02 : f32
    %172 = vector.broadcast %cst_95 : f32 to vector<8x128xf32>
    %173 = arith.addf %172, %171 : vector<8x128xf32>
    %c0_96 = arith.constant 0 : index
    %c10 = arith.constant 10 : index
    %c0_97 = arith.constant 0 : index
    %c0_98 = arith.constant 0 : index
    %174 = vector.load %arg7[%c0_96, %c10, %c0_97, %c0_98] : memref<1x12x8x128xf32, #tpu.memory_space<vmem>>, vector<1x1x8x128xf32>
    %175 = vector.shape_cast %174 : vector<1x1x8x128xf32> to vector<8x128xf32>
    %176 = arith.mulf %82, %175 : vector<8x128xf32>
    %cst_99 = arith.constant 1.000000e+00 : f32
    %177 = vector.broadcast %cst_99 : f32 to vector<8x128xf32>
    %178 = arith.subf %177, %173 : vector<8x128xf32>
    %c0_100 = arith.constant 0 : index
    %c7 = arith.constant 7 : index
    %c0_101 = arith.constant 0 : index
    %c0_102 = arith.constant 0 : index
    %179 = vector.load %arg7[%c0_100, %c7, %c0_101, %c0_102] : memref<1x12x8x128xf32, #tpu.memory_space<vmem>>, vector<1x1x8x128xf32>
    %180 = vector.shape_cast %179 : vector<1x1x8x128xf32> to vector<8x128xf32>
    %181 = arith.mulf %178, %180 : vector<8x128xf32>
    %182 = arith.addf %173, %181 : vector<8x128xf32>
    %183 = arith.mulf %120, %182 : vector<8x128xf32>
    %184 = arith.mulf %183, %176 : vector<8x128xf32>
    %cst_103 = arith.constant 9.99999996E-13 : f32
    %cst_104 = arith.constant 1.000000e+00 : f32
    %185 = vector.broadcast %cst_103 : f32 to vector<8x128xf32>
    %186 = arith.maximumf %185, %184 : vector<8x128xf32>
    %187 = vector.broadcast %cst_104 : f32 to vector<8x128xf32>
    %188 = arith.minimumf %187, %186 : vector<8x128xf32>
    %189 = arith.mulf %168, %124 : vector<8x128xf32>
    %190 = arith.mulf %189, %176 : vector<8x128xf32>
    %191 = arith.addf %188, %190 : vector<8x128xf32>
    %cst_105 = arith.constant 1.000000e+00 : f32
    %192 = vector.broadcast %cst_105 : f32 to vector<8x128xf32>
    %193 = arith.minimumf %191, %192 : vector<8x128xf32>
    %194 = math.log %193 : vector<8x128xf32>
    %cst_106 = arith.constant 0.454545468 : f32
    %195 = vector.broadcast %cst_106 : f32 to vector<8x128xf32>
    %196 = arith.mulf %195, %194 : vector<8x128xf32>
    %197 = math.exp %196 : vector<8x128xf32>
    %c0_107 = arith.constant 0 : index
    %c1_108 = arith.constant 1 : index
    %c0_109 = arith.constant 0 : index
    %c0_110 = arith.constant 0 : index
    %198 = vector.load %arg8[%c0_107, %c1_108, %c0_109, %c0_110] : memref<1x3x8x128xf32, #tpu.memory_space<vmem>>, vector<1x1x8x128xf32>
    %199 = vector.shape_cast %198 : vector<1x1x8x128xf32> to vector<8x128xf32>
    %200 = vector.shape_cast %197 : vector<8x128xf32> to vector<1x1x8x128xf32>
    tpu.vector_store %arg8[%c0_107, %c1_108, %c0_109, %c0_110], %200 {strides = array<i32>} : memref<1x3x8x128xf32, #tpu.memory_space<vmem>>, vector<1x1x8x128xf32>,
    %c0_111 = arith.constant 0 : index
    %c2_112 = arith.constant 2 : index
    %c0_113 = arith.constant 0 : index
    %c0_114 = arith.constant 0 : index
    %201 = vector.load %arg3[%c0_111, %c2_112, %c0_113, %c0_114] : memref<1x3x8x128xf32, #tpu.memory_space<vmem>>, vector<1x1x8x128xf32>
    %202 = vector.shape_cast %201 : vector<1x1x8x128xf32> to vector<8x128xf32>
    %203 = math.log %202 : vector<8x128xf32>
    %cst_115 = arith.constant 2.200000e+00 : f32
    %204 = vector.broadcast %cst_115 : f32 to vector<8x128xf32>
    %205 = arith.mulf %204, %203 : vector<8x128xf32>
    %206 = math.exp %205 : vector<8x128xf32>
    %cst_116 = arith.constant 4.000000e-02 : f32
    %207 = vector.broadcast %cst_116 : f32 to vector<8x128xf32>
    %208 = arith.subf %206, %207 : vector<8x128xf32>
    %209 = arith.mulf %208, %86 : vector<8x128xf32>
    %cst_117 = arith.constant 4.000000e-02 : f32
    %210 = vector.broadcast %cst_117 : f32 to vector<8x128xf32>
    %211 = arith.addf %210, %209 : vector<8x128xf32>
    %c0_118 = arith.constant 0 : index
    %c11 = arith.constant 11 : index
    %c0_119 = arith.constant 0 : index
    %c0_120 = arith.constant 0 : index
    %212 = vector.load %arg7[%c0_118, %c11, %c0_119, %c0_120] : memref<1x12x8x128xf32, #tpu.memory_space<vmem>>, vector<1x1x8x128xf32>
    %213 = vector.shape_cast %212 : vector<1x1x8x128xf32> to vector<8x128xf32>
    %214 = arith.mulf %82, %213 : vector<8x128xf32>
    %cst_121 = arith.constant 1.000000e+00 : f32
    %215 = vector.broadcast %cst_121 : f32 to vector<8x128xf32>
    %216 = arith.subf %215, %211 : vector<8x128xf32>
    %c0_122 = arith.constant 0 : index
    %c8 = arith.constant 8 : index
    %c0_123 = arith.constant 0 : index
    %c0_124 = arith.constant 0 : index
    %217 = vector.load %arg7[%c0_122, %c8, %c0_123, %c0_124] : memref<1x12x8x128xf32, #tpu.memory_space<vmem>>, vector<1x1x8x128xf32>
    %218 = vector.shape_cast %217 : vector<1x1x8x128xf32> to vector<8x128xf32>
    %219 = arith.mulf %216, %218 : vector<8x128xf32>
    %220 = arith.addf %211, %219 : vector<8x128xf32>
    %221 = arith.mulf %120, %220 : vector<8x128xf32>
    %222 = arith.mulf %221, %214 : vector<8x128xf32>
    %cst_125 = arith.constant 9.99999996E-13 : f32
    %cst_126 = arith.constant 1.000000e+00 : f32
    %223 = vector.broadcast %cst_125 : f32 to vector<8x128xf32>
    %224 = arith.maximumf %223, %222 : vector<8x128xf32>
    %225 = vector.broadcast %cst_126 : f32 to vector<8x128xf32>
    %226 = arith.minimumf %225, %224 : vector<8x128xf32>
    %227 = arith.mulf %206, %124 : vector<8x128xf32>
    %228 = arith.mulf %227, %214 : vector<8x128xf32>
    %229 = arith.addf %226, %228 : vector<8x128xf32>
    %cst_127 = arith.constant 1.000000e+00 : f32
    %230 = vector.broadcast %cst_127 : f32 to vector<8x128xf32>
    %231 = arith.minimumf %229, %230 : vector<8x128xf32>
    %232 = math.log %231 : vector<8x128xf32>
    %cst_128 = arith.constant 0.454545468 : f32
    %233 = vector.broadcast %cst_128 : f32 to vector<8x128xf32>
    %234 = arith.mulf %233, %232 : vector<8x128xf32>
    %235 = math.exp %234 : vector<8x128xf32>
    %c0_129 = arith.constant 0 : index
    %c2_130 = arith.constant 2 : index
    %c0_131 = arith.constant 0 : index
    %c0_132 = arith.constant 0 : index
    %236 = vector.load %arg8[%c0_129, %c2_130, %c0_131, %c0_132] : memref<1x3x8x128xf32, #tpu.memory_space<vmem>>, vector<1x1x8x128xf32>
    %237 = vector.shape_cast %236 : vector<1x1x8x128xf32> to vector<8x128xf32>
    %238 = vector.shape_cast %235 : vector<8x128xf32> to vector<1x1x8x128xf32>
    tpu.vector_store %arg8[%c0_129, %c2_130, %c0_131, %c0_132], %238 {strides = array<i32>} : memref<1x3x8x128xf32, #tpu.memory_space<vmem>>, vector<1x1x8x128xf32>,
    return
  }
  func.func @transform_0(%arg0: i32, %arg1: i32, %arg2: memref<1xi32, #tpu.memory_space<smem>>) -> (i32, i32, i32, i32) {
    %c0_i32 = arith.constant 0 : i32
    %c0_i32_0 = arith.constant 0 : i32
    %c0_i32_1 = arith.constant 0 : i32
    return %arg1, %c0_i32, %arg0, %c0_i32_0 : i32, i32, i32, i32
  }
  func.func @transform_1(%arg0: i32, %arg1: i32, %arg2: memref<1xi32, #tpu.memory_space<smem>>) -> (i32, i32, i32, i32) {
    %c0_i32 = arith.constant 0 : i32
    %c0_i32_0 = arith.constant 0 : i32
    %c0_i32_1 = arith.constant 0 : i32
    return %arg1, %c0_i32, %arg0, %c0_i32_0 : i32, i32, i32, i32
  }
  func.func @transform_2(%arg0: i32, %arg1: i32, %arg2: memref<1xi32, #tpu.memory_space<smem>>) -> (i32, i32, i32, i32) {
    %c0_i32 = arith.constant 0 : i32
    %c0_i32_0 = arith.constant 0 : i32
    %c0_i32_1 = arith.constant 0 : i32
    return %arg1, %c0_i32, %arg0, %c0_i32_0 : i32, i32, i32, i32
  }
  func.func @transform_3(%arg0: i32, %arg1: i32, %arg2: memref<1xi32, #tpu.memory_space<smem>>) -> (i32, i32, i32, i32) {
    %c0_i32 = arith.constant 0 : i32
    %c0_i32_0 = arith.constant 0 : i32
    %c0_i32_1 = arith.constant 0 : i32
    return %arg1, %c0_i32, %arg0, %c0_i32_0 : i32, i32, i32, i32
  }
  func.func @transform_4(%arg0: i32, %arg1: i32, %arg2: memref<1xi32, #tpu.memory_space<smem>>) -> (i32, i32, i32, i32) {
    %c0 = arith.constant 0 : index
    %0 = memref.load %arg2[%c0] : memref<1xi32, #tpu.memory_space<smem>>
    %c0_i32 = arith.constant 0 : i32
    %c0_i32_0 = arith.constant 0 : i32
    %c0_i32_1 = arith.constant 0 : i32
    return %0, %c0_i32, %arg0, %c0_i32_0 : i32, i32, i32, i32
  }
  func.func @transform_5(%arg0: i32, %arg1: i32, %arg2: memref<1xi32, #tpu.memory_space<smem>>) -> (i32, i32, i32, i32) {
    %c0_i32 = arith.constant 0 : i32
    %c0_i32_0 = arith.constant 0 : i32
    %c0_i32_1 = arith.constant 0 : i32
    return %arg1, %c0_i32, %arg0, %c0_i32_0 : i32, i32, i32, i32
  }
}

</mosaic_0001>

<bundles_post_ra>
// kernel: tpu_custom_call.1
= control target key start
LH: loop header
LB: loop body
LE: loop exit
PB: predicated region body
PF: predicated region fallthrough
CT: control target
= control target key end

     0   :  { %s1583_s0 = inlined_call_operand.<no memory space> [shape: s32[1], index: 0, kind: input, shape index: {}]   ;;  %s1584_s1 = inlined_call_operand.hbm [shape: f32[2,3,8,128], index: 1, kind: input, shape index: {}]   ;;  %s1585_s2 = inlined_call_operand.hbm [shape: f32[2,3,8,128], index: 2, kind: input, shape index: {}]   ;;  %s1586_s3 = inlined_call_operand.hbm [shape: f32[2,1,8,128], index: 3, kind: input, shape index: {}]   ;;  %s1587_s4 = inlined_call_operand.hbm [shape: f32[2,1,8,128], index: 4, kind: input, shape index: {}]   ;;  %s1588_s5 = inlined_call_operand.hbm [shape: f32[5,12,8,128], index: 5, kind: input, shape index: {}]   ;;  %s1589_s6 = inlined_call_operand.hbm [shape: f32[2,3,8,128], index: 6, kind: output, shape index: {}]  }
   0x1   :  { %1600 = sst [smem:[#allocation25_spill]] %s1584_s1 }
   0x2   :  { %1601 = sst [smem:[#allocation26_spill]] %s1585_s2 }
   0x3   :  { %1602 = sst [smem:[#allocation27_spill]] %s1588_s5 }
   0x4   :  { %11 = sst [smem:[#allocation3]] %s1583_s0 }
   0x5   :  { %12 = vsyncpa [#allocation5], 0 }
   0x6   :  { %14 = vsyncpa [#allocation5 + $0x1], 0 }
   0x7   :  { %15 = vsyncpa [#allocation8], 0 }
   0x8   :  { %17 = vsyncpa [#allocation8 + $0x1], 0 }
   0x9   :  { %18 = vsyncpa [#allocation11], 0 }
   0xa   :  { %20 = vsyncpa [#allocation11 + $0x1], 0 }
   0xb   :  { %21 = vsyncpa [#allocation6], 0 }
   0xc   :  { %23 = vsyncpa [#allocation6 + $0x1], 0  ;;  %s1321_s23 = smov 0   ;;  %s1323_s24 = smov 0  }
   0xd   :  { %s1325_s25 = smov 0   ;;  %s1327_s26 = smov 0  }
   0xe   :  { %s1329_s27 = smov 0   ;;  %s1331_s28 = smov 0  }
   0xf   :  { %s1333_s0 = smov 0   ;;  %s1335_s29 = smov 0  }
  0x10 LB: > { %1603 = sst [smem:[#allocation19_spill]] %s1252_s24  ;;  %s1360_s30 = sadd.s32 4294967295, %s1276_s29   ;;  %s1276_s29 = sphi %s1335_s29, %s29_s29   ;;  %s1272_s0 = sphi %s1333_s0, %s1634_s0   ;;  %s1268_s28 = sphi %s1331_s28, %s1633_s28   ;;  %s1264_s27 = sphi %s1329_s27, %s1629_s27   ;;  %s1260_s26 = sphi %s1327_s26, %s1632_s26   ;;  %s1256_s25 = sphi %s1325_s25, %s1631_s25   ;;  %s1252_s24 = sphi %s1323_s24, %s1564_s24   ;;  %s1248_s23 = sphi %s1321_s23, %s1627_s23  }
  0x11   : > { %1604 = sst [smem:[#allocation20_spill]] %s1256_s25  ;;  %s832_s7 = sadd.s32 4294967294, %s1276_s29  }
  0x12   : > { %1605 = sst [smem:[#allocation21_spill]] %s1264_s27  ;;  %p63_p0 = scmp.ne.s32.totalorder %s1260_s26, %s1256_s25 }
  0x13   : > { %p64_p1 = scmp.eq.s32.totalorder %s1360_s30, 0  ;;  %s157_s8 = sld [smem:[#allocation3]] }
  0x14   : > { %p177_p3 = scmp.ne.s32.totalorder %s1252_s24, %s1248_s23  ;;  %p209_p5 = scmp.eq.s32.totalorder %s832_s7, 1 }
  0x15   : > { %p1366_p2 = por %p64_p1, %p63_p0  ;;  %p833_p7 = scmp.ge.s32.totalorder %s1276_s29, 1 }
  0x16   : > { %p1372_p6 = por %p177_p3, %p64_p1  ;;  %p1377_p8 = por %p209_p5, %p63_p0 }
  0x17   : > { %p216_p9 = scmp.lt.s32.totalorder %s1276_s29, 3  ;;  %s1278_s14 = smov [#allocation12]  }
  0x18   : > { %s1608_s11 = scalar_select %p1377_p8, 1, 0 }
  0x19   : > { %p1382_p10 = pnand %p833_p7, %p216_p9  ;;  %s863_s13 = smul.u32 96, %s157_s8 }
  0x1a   : > { %1609 = sst [smem:[#allocation22_spill]] %s1608_s11  ;;  %s234_s15 = sshll.u32 %s1278_s14, 4  ;;  %s235_s15 = int_to_ptr.vmem [resolvable:$true] %s234_s15 }
  0x1b   : > { %p882_p11 = pneg %p1382_p10  ;;  %s1611_s5 = sld [smem:[#allocation27_spill]] }
  0x1c   : > { %p835_p13 = scmp.ge.s32.totalorder %s1276_s29, 2 }
  0x1d   : > { %p1393_p12 = pnand %p882_p11, %p1372_p6 }
  0x1f   : > { %p1016_p1 = pneg %p1393_p12 }
  0x21   : > { %s231_s18 = scalar_lea.hbm %s1611_s5, %s863_s13  ;;  %s1019_s8 = scalar_lea.hbm %s1611_s5, 480 }
  0x22   : > { %s232_s19 = sshll.u32 %s231_s18, 4  ;;  %s233_s19 = int_to_ptr.hbm [resolvable:$true] %s232_s19 }
  0x23   : > { %s1012_s21 = sshra.s32 %s233_s19, 4  ;;  %s1013_s21 = int_to_ptr.hbm [resolvable:$true] %s1012_s21 }
  0x24   : > { %s1014_s22 = scalar_lea.hbm %s1013_s21, 96  ;;  %p1020_p7 = scmp.lt.s32.totalorder %s1013_s21, %s1611_s5 }
  0x25   : > { %p1015_p0 = scmp.ne.s32.totalorder %s1013_s21, %s1014_s22  ;;  %p1021_p9 = scmp.lt.s32.totalorder %s1019_s8, %s1014_s22 }
  0x27   : > { %p1017_p3 = pnand %p1016_p1, %p1015_p0  ;;  %p1022_p11 = por %p1021_p9, %p1020_p7 }
  0x29   : > { %p1018_p5 = pneg %p1017_p3 }
  0x2b   : > { %p1023_p4 = pnand %p1022_p11, %p1018_p5 }
  0x2d   : > { %1026 = shalt.err (!%p1023_p4)
}
  0x2e   : > { %s1590_s16 = smov 128   ;;  %s1592_s17 = smov 8  }
  0x2f   : > { %885 = dma.hbm_to_vmem [thread:$0]  (!%p1393_p12), %s233_s19, 1536, %s235_s15, [#allocation11], %s1590_s16, %s1590_s16, %s1592_s17  }
  0x30   : > { %s38_s18 = sadd.s32 1, %s1272_s0  ;;  %s50_s21 = sadd.s32 1, %s1264_s27 }
  0x31   : > { %p39_p4 = scmp.ge.s32.totalorder %s38_s18, 2  ;;  %p57_p0 = scmp.ne.s32.totalorder %s1264_s27, %s1260_s26 }
  0x32   : > { %p58_p1 = scmp.eq.s32.totalorder %s1276_s29, 0  ;;  %p903_p3 = scmp.lt.s32.totalorder %s1276_s29, 2 }
  0x33   : > { %s1636_s18 = smov (%p39_p4, %s38_s18), 0  ;;  %p1614_p7 = scmp.eq.s32.totalorder %s1360_s30, 1 }
  0x34   : > { %1613 = sst [smem:[#allocation23_spill]] %s1636_s18  ;;  %p59_p5 = por %p58_p1, %p57_p0 }
  0x35   : > { %p1421_p9 = por %p1614_p7, %p57_p0  ;;  %s45_s22 = ssub.s32 %s1272_s0, %s1636_s18 }
  0x36   : > { %s1428_s15 = sand.u32 1, %s1264_s27   ;;  %p48_p12 = scmp.eq.s32.totalorder %s45_s22, 0 }
  0x37   : > { %s864_s19 = smul.u32 24, %s1428_s15  ;;  %p1432_p11 = pnand %p903_p3, %p59_p5 }
  0x38   : > { %s865_s23 = smul.u32 24, %s1272_s0  ;;  %s1599_s13 = sand.u32 1, %s1276_s29  }
  0x39   : > { %s1437_s8 = scalar_select %p48_p12, %s1264_s27, %s50_s21  }
  0x3a   : > { %s1618_s2 = sld [smem:[#allocation26_spill]]  ;;  %s275_s5 = scalar_lea.vmem [#allocation7], %s864_s19 }
  0x3b   : > { %1617 = sst [smem:[#allocation24_spill]] %s1437_s8  ;;  %s284_s22 = sshll.u32 %s275_s5, 4  ;;  %s285_s22 = int_to_ptr.vmem [resolvable:$true] %s284_s22 }
  0x3c   : > { %s272_s24 = scalar_lea.sflag [#allocation8], %s1599_s13  ;;  %s1619_s11 = smov 8  }
  0x3d   : > { %s1620_s21 = smov 128   ;;  %s1621_s1 = sld [smem:[#allocation25_spill]] }
  0x3e   : > { %s249_s5 = scalar_lea.sflag [#allocation5], %s1428_s15  ;;  %s1476_s13 = sand.u32 (!%p1382_p10), 1, %s1260_s26  }
  0x40   : > { %s281_s17 = scalar_lea.hbm %s1618_s2, %s865_s23  ;;  %s252_s2 = scalar_lea.vmem [#allocation4], %s864_s19 }
  0x41   : > { %s282_s18 = sshll.u32 %s281_s17, 4  ;;  %s261_s25 = sshll.u32 %s252_s2, 4  ;;  %s283_s18 = int_to_ptr.hbm [resolvable:$true] %s282_s18  ;;  %s262_s25 = int_to_ptr.vmem [resolvable:$true] %s261_s25 }
  0x42   : > { %892 = dma.hbm_to_vmem [thread:$0]  (!%p1432_p11), %s283_s18, 384, %s285_s22, %s272_s24, %s1620_s21, %s1620_s21, %s1619_s11  }
  0x43   : > { %s258_s16 = scalar_lea.hbm %s1621_s1, %s865_s23  ;;  %s838_s17 = sshll.u32 %s1428_s15, 3 }
  0x44   : > { %s259_s14 = sshll.u32 %s258_s16, 4  ;;  %s839_s18 = sshll.u32 %s1272_s0, 3  ;;  %s260_s14 = int_to_ptr.hbm [resolvable:$true] %s259_s14 }
  0x45   : > { %889 = dma.hbm_to_vmem [thread:$0]  (!%p1432_p11), %s260_s14, 384, %s262_s25, %s249_s5, %s1620_s21, %s1620_s21, %s1619_s11  }
  0x46   : > { %s303_s27 = scalar_lea.hbm %s1586_s3, %s839_s18  ;;  %s298_s8 = scalar_lea.vmem [#allocation9], %s838_s17 }
  0x47   : > { %s305_s23 = sshll.u32 %s303_s27, 4  ;;  %s307_s19 = sshll.u32 %s298_s8, 4  ;;  %s306_s23 = int_to_ptr.hbm [resolvable:$true] %s305_s23  ;;  %s308_s19 = int_to_ptr.vmem [resolvable:$true] %s307_s19 }
  0x48   : > { %895 = dma.hbm_to_vmem [thread:$0]  (!%p1432_p11), %s306_s23, 128, %s308_s19, %s272_s24  }
  0x49   : > { %s323_s1 = scalar_lea.hbm %s1587_s4, %s839_s18  ;;  %s318_s25 = scalar_lea.vmem [#allocation10], %s838_s17 }
  0x4a   : > { %s327_s11 = sshll.u32 %s318_s25, 4  ;;  %s325_s15 = sshll.u32 %s323_s1, 4  ;;  %s328_s11 = int_to_ptr.vmem [resolvable:$true] %s327_s11  ;;  %s326_s15 = int_to_ptr.hbm [resolvable:$true] %s325_s15 }
  0x4b   : > { %s1622_s21 = sand.u32 1, %s1276_s29   ;;  %336 = sbr.rel (%p1382_p10) target bundleno = 204 (0xcc), region = 40 }
  0x4c   : > { %s315_s14 = scalar_lea.sflag [#allocation11], %s1622_s21  ;;  %s1479_s24 = smul.u32 (!%p1382_p10), 24, %s1476_s13 }
  0x4d   : > { %898 = dma.hbm_to_vmem [thread:$0]  (!%p1432_p11), %s326_s15, 128, %s328_s11, %s315_s14  }
  0x4e   : > { %s339_s5 = scalar_lea.sflag (!%p1382_p10), [#allocation5], %s1476_s13  ;;  %s1483_s1 = scalar_lea.vmem (!%p1382_p10), [#allocation4], %s1479_s24 }
  0x50   : > { %1227 = dma.done.wait (%p1366_p2), %s339_s5, 384  }
  0x51   : > { %1229 = vsyncadd (%p1366_p2), %s339_s5, 4294966912  ;;  %s348_s12 = sand.u32 1, %s1360_s30   ;;  %s352_s17 = scalar_lea.vmem [#allocation7], %s1479_s24 }
  0x52   : > { %s349_s7 = scalar_lea.sflag [#allocation8], %s348_s12 }
  0x53   : > { %1231 = dma.done.wait (%p1366_p2), %s349_s7, 512  }
  0x54   : > { %1233 = vsyncadd (%p1366_p2), %s349_s7, 4294966784  ;;  %s843_s18 = sshll.u32 %s1476_s13, 3  ;;  %s369_s27 = scalar_lea.sflag [#allocation11], %s348_s12 }
  0x55   : > { %s1496_s22 = scalar_lea.vmem [#allocation9], %s843_s18  ;;  %s1498_s23 = scalar_lea.vmem [#allocation10], %s843_s18 }
  0x56   : > { %1235 = dma.done.wait (%p1366_p2), %s369_s27, 128  }
  0x57   : > { %1237 = vsyncadd (%p1366_p2), %s369_s27, 4294967168 }
  0x58   : > { %1239 = dma.done.wait (%p1372_p6), [#allocation11], 1536  }
  0x59   : > { %1241 = vsyncadd (%p1372_p6), [#allocation11], 4294965760  ;;  %v421_v0 = vld [vmem:[%s352_s17] sm:$0xff]  ;;  %v846_v1 = vld [vmem:[%s352_s17 + $0x8] sm:$0xff]  ;;  %s869_s30 = smul.u32 24, %s1268_s28  ;;  %s419_s19 = scalar_lea.vmem [#allocation13], %s1479_s24 }
  0x5a   : > { %v847_v2 = vld [vmem:[%s352_s17 + $0x10] sm:$0xff]  ;;  %v845_v3 = vadd.f32 -0.5, %v421_v0  ;;  %v426_v4 = vsub.f32 0.5, %v846_v1  ;;  %v854_v16 = vld [vmem:[%s1483_s1 + $0x8] sm:$0xff]  ;;  %v857_v17 = vld [vmem:[%s1483_s1 + $0x10] sm:$0xff]  ;;  %s660_s2 = sshll.u32 %s419_s19, 4  ;;  %s661_s2 = int_to_ptr.vmem [resolvable:$true] %s660_s2 }
  0x5b   : > { %v848_v5 = vadd.f32 -0.5, %v847_v2  ;;  %v549_v15 = vld [vmem:[%s1483_s1] sm:$0xff]  ;;  %v462_v20 = vld [vmem:[#allocation12 + $0x8] sm:$0xff]  ;;  %v476_v23 = vld [vmem:[#allocation12 + $0x10] sm:$0xff]  ;;  %s659_s8 = scalar_lea.hbm %s1589_s6, %s869_s30  ;;  %s647_s28 = scalar_lea.sflag [#allocation6], %s1476_s13 }
  0x5c   : > { %v423_v6 = vmul.f32 2.0, %v845_v3  ;;  %v427_v7 = vmul.f32 2.0, %v426_v4  ;;  %v451_v18 = vld [vmem:[#allocation12] sm:$0xff]  ;;  %v453_v19 = vld [vmem:[#allocation12 + $0x18] sm:$0xff]  ;;  %v478_v24 = vld [vmem:[#allocation12 + $0x28] sm:$0xff]  ;;  %s662_s16 = sshll.u32 %s659_s8, 4  ;;  %s663_s16 = int_to_ptr.hbm [resolvable:$true] %s662_s16 }
  0x5d   : > { %v431_v8 = vmul.f32 2.0, %v848_v5  ;;  %v464_v22 = vld [vmem:[#allocation12 + $0x20] sm:$0xff]  ;;  %v454_v26 = vadd.f32 %v453_v19, %v451_v18  ;;  %v479_v29 = vadd.f32 %v478_v24, %v476_v23  ;;  %s1176_s25 = sshra.s32 %s663_s16, 4  ;;  %s1182_s14 = scalar_lea.hbm %s1589_s6, 48  ;;  %s1177_s25 = int_to_ptr.hbm [resolvable:$true] %s1176_s25 }
  0x5e   : > { %v432_v9 = vmul.f32 %v423_v6, %v423_v6  ;;  %v433_v10 = vmul.f32 %v427_v7, %v427_v7  ;;  %v465_v28 = vadd.f32 %v464_v22, %v462_v20  ;;  %v492_v30 = vld [vmem:[%s1496_s22] sm:$0xff]  ;;  %s1178_s11 = scalar_lea.hbm %s1177_s25, 24  ;;  %p1183_p4 = scmp.lt.s32.totalorder %s1177_s25, %s1589_s6 }
  0x5f   : > { %v435_v11 = vmul.f32 %v431_v8, %v431_v8  ;;  %v455_v35 = vmul.f32 1e+12, %v454_v26  ;;  %v494_v36 = vmul.f32 %v492_v30, %v492_v30  ;;  %v480_v39 = vmul.f32 1e+12, %v479_v29  ;;  %p1179_p2 = scmp.ne.s32.totalorder %s1177_s25, %s1178_s11  ;;  %p1184_p0 = scmp.lt.s32.totalorder %s1182_s14, %s1178_s11 }
  0x60   : > { %v434_v12 = vadd.f32 %v433_v10, %v432_v9  ;;  %v466_v38 = vmul.f32 1e+12, %v465_v28 }
  0x61   : > { %v503_v40 = vmul.f32 0.5, %v494_v36  ;;  %v849_v45 = vclamps-f32 %v455_v35, 1.0  ;;  %v851_v48 = vclamps-f32 %v480_v39, 1.0  ;;  %v495_v4 = vmul.f32 %v494_v36, %v494_v36  ;;  %p1180_p6 = pnand %p1179_p2, %p1421_p9  ;;  %p1185_p1 = por %p1184_p0, %p1183_p4 }
  0x62   : > { %v436_v13 = vadd.f32 %v435_v11, %v434_v12  ;;  %v850_v47 = vclamps-f32 %v466_v38, 1.0 }
  0x63   : > { %v504_v52 = vmax.f32 %v503_v40, 1e-12  ;;  %p1181_p10 = pneg %p1180_p6 }
  0x64   : > { %v437_v14 = vmax.f32 %v436_v13, 1e-24 }
  0x65   : > { %p1186_p3 = pnand %p1185_p1, %p1181_p10 }
  0x66   : > { %982 = vrsqrt.f32 %v437_v14  ;;  %vm444_vm0 = vweird.f32 %v437_v14 }
  0x67   : > { %984 = vlog2.f32 %v549_v15  ;;  %v852_v15 = vadd.f32 -1.0, %v495_v4 }
  0x68   : > { %986 = vlog2.f32 %v854_v16 }
  0x69   : > { %988 = vlog2.f32 %v857_v17 }
  0x6c   : > { %v983_v21 = vpop.eup %982 }
  0x6d   : > { %v439_v25 = vmul.f32 %v983_v21, %v437_v14  ;;  %v985_v31 = vpop.eup %984  ;;  %vm445_vm1 = vweird.f32 %v983_v21 }
  0x6e   : > { %v987_v32 = vpop.eup %986  ;;  %vm446_vm2 = vmor %vm444_vm0, %vm445_vm1  ;;  %v551_v42 = vmul.f32 0.6931472, %v985_v31 }
  0x6f   : > { %v440_v27 = vmul.f32 %v983_v21, %v439_v25  ;;  %v989_v34 = vpop.eup %988  ;;  %v583_v43 = vmul.f32 0.6931472, %v987_v32 }
  0x70   : > { %v616_v44 = vmul.f32 0.6931472, %v989_v34  ;;  %v552_v53 = vmul.f32 2.2, %v551_v42  ;;  %v493_v34 = vld [vmem:[%s1498_s23] sm:$0xff] }
  0x71   : > { %v441_v33 = vmul.f32 0.5, %v440_v27  ;;  %v584_v54 = vmul.f32 2.2, %v583_v43 }
  0x72   : > { %v617_v55 = vmul.f32 2.2, %v616_v44  ;;  %v553_v5 = vmul.f32 1.442695, %v552_v53 }
  0x73   : > { %v442_v37 = vsub.f32 1.5, %v441_v33 }
  0x74   : > { %v618_v11 = vmul.f32 1.442695, %v617_v55  ;;  %990 = vpow2.f32 %v553_v5 }
  0x75   : > { %v443_v41 = vmul.f32 %v983_v21, %v442_v37 }
  0x77   : > { %v447_v46 = vsel %vm446_vm2, %v983_v21, %v443_v41 }
  0x78   : > { %v448_v49 = vmul.f32 %v447_v46, %v423_v6  ;;  %v449_v50 = vmul.f32 %v447_v46, %v427_v7  ;;  %v450_v51 = vmul.f32 %v447_v46, %v431_v8  ;;  %v505_v7 = vsub.f32 1.0, %v504_v52 }
  0x79   : > { %v585_v8 = vmul.f32 1.442695, %v584_v54 }
  0x7a   : > { %v458_v56 = vmul.f32 %v451_v18, %v448_v49  ;;  %v459_v57 = vmul.f32 %v453_v19, %v448_v49  ;;  %v460_v58 = vmul.f32 %v849_v45, %v448_v49  ;;  %v469_v59 = vmul.f32 %v462_v20, %v449_v50 }
  0x7b   : > { %v471_v60 = vmul.f32 %v464_v22, %v449_v50  ;;  %v473_v61 = vmul.f32 %v850_v47, %v449_v50  ;;  %v483_v62 = vmul.f32 %v476_v23, %v450_v51  ;;  %v485_v63 = vmul.f32 %v478_v24, %v450_v51  ;;  %v1516_v23 = vpop.eup %990 }
  0x7c   : > { %v470_v0 = vadd.f32 %v469_v59, %v458_v56  ;;  %v487_v1 = vmul.f32 %v851_v48, %v450_v51  ;;  %992 = vpow2.f32 %v585_v8  ;;  %v853_v30 = vadd.f32 -0.04, %v1516_v23 }
  0x7d   : > { %v472_v2 = vadd.f32 %v471_v60, %v459_v57  ;;  %v474_v3 = vadd.f32 %v473_v61, %v460_v58  ;;  %994 = vpow2.f32 %v618_v11  ;;  %v563_v57 = vld [vmem:[#allocation12 + $0x30] sm:$0xff]  ;;  %v595_v61 = vld [vmem:[#allocation12 + $0x38] sm:$0xff] }
  0x7e   : > { %v484_v6 = vadd.f32 %v483_v62, %v470_v0  ;;  %v556_v39 = vmul.f32 %v853_v30, %v493_v34  ;;  %v628_v62 = vld [vmem:[#allocation12 + $0x40] sm:$0xff] }
  0x7f   : > { %v486_v9 = vadd.f32 %v485_v63, %v472_v2  ;;  %v488_v10 = vadd.f32 %v487_v1, %v474_v3  ;;  %v547_v2 = vsub.f32 1.0, %v493_v34 }
  0x80   : > { %v489_v12 = vmax.f32 %v484_v6, 0.0  ;;  %v557_v44 = vadd.f32 0.04, %v556_v39 }
  0x81   : > { %v490_v13 = vmax.f32 %v486_v9, 0.0  ;;  %v1512_v14 = vmax.f32 %v488_v10, 0.0 }
  0x82   : > { %v506_v16 = vmul.f32 %v505_v7, %v489_v12  ;;  %v510_v19 = vmul.f32 4.0, %v489_v12  ;;  %v1518_v27 = vpop.eup %992  ;;  %v513_v49 = vmul.f32 %v495_v4, %v489_v12  ;;  %v561_v50 = vsub.f32 1.0, %v557_v44 }
  0x83   : > { %v496_v17 = vmul.f32 %v1512_v14, %v1512_v14  ;;  %v508_v18 = vmul.f32 %v505_v7, %v490_v13  ;;  %v1520_v28 = vpop.eup %994  ;;  %v855_v33 = vadd.f32 -0.04, %v1518_v27 }
  0x84   : > { %v507_v20 = vadd.f32 %v506_v16, %v504_v52  ;;  %v511_v25 = vmul.f32 %v510_v19, %v490_v13  ;;  %v858_v35 = vadd.f32 -0.04, %v1520_v28  ;;  %v514_v0 = vmul.f32 %v513_v49, %v490_v13  ;;  %v559_v13 = vld [vmem:[#allocation12 + $0x48] sm:$0xff]  ;;  %v591_v16 = vld [vmem:[#allocation12 + $0x50] sm:$0xff] }
  0x85   : > { %v498_v21 = vmul.f32 %v852_v15, %v496_v17  ;;  %v509_v22 = vadd.f32 %v508_v18, %v504_v52  ;;  %v588_v40 = vmul.f32 %v855_v33, %v493_v34  ;;  %v564_v3 = vmul.f32 %v563_v57, %v561_v50  ;;  %v624_v17 = vld [vmem:[#allocation12 + $0x58] sm:$0xff] }
  0x86   : > { %v512_v32 = vmax.f32 %v511_v25, 1e-12  ;;  %v621_v42 = vmul.f32 %v858_v35, %v493_v34  ;;  %v548_v15 = vmul.f32 0.31830987, %v547_v2  ;;  %v592_v25 = vmul.f32 %v591_v16, %v1512_v14 }
  0x87   : > { %v499_v24 = vadd.f32 1.0, %v498_v21  ;;  %v531_v26 = vmul.f32 %v509_v22, %v507_v20  ;;  %v589_v45 = vadd.f32 0.04, %v588_v40  ;;  %v565_v19 = vadd.f32 %v564_v3, %v557_v44 }
  0x88   : > { %v622_v46 = vadd.f32 0.04, %v621_v42  ;;  %v602_v30 = vmul.f32 %v1518_v27, %v548_v15  ;;  %v635_v34 = vmul.f32 %v1520_v28, %v548_v15 }
  0x89   : > { %v500_v29 = vmul.f32 %v499_v24, %v499_v24  ;;  %996 = vrcp.f32 %v531_v26  ;;  %v593_v51 = vsub.f32 1.0, %v589_v45  ;;  %vm537_vm3 = vweird.f32 %v531_v26 }
  0x8a   : > { %v626_v53 = vsub.f32 1.0, %v622_v46  ;;  %v541_v55 = vand.u32 2147483647, %v531_v26  ;;  %v543_v56 = vand.u32 2147483648, %v531_v26  ;;  %v560_v24 = vmul.f32 %v559_v13, %v1512_v14 }
  0x8b   : > { %v501_v31 = vmul.f32 3.1415927, %v500_v29  ;;  %v596_v6 = vmul.f32 %v595_v61, %v593_v51  ;;  %v570_v29 = vmul.f32 %v1516_v23, %v548_v15  ;;  %v603_v39 = vmul.f32 %v602_v30, %v592_v25 }
  0x8c   : > { %v544_v5 = vor.u32 1.1754944e-38, %v543_v56  ;;  %v629_v7 = vmul.f32 %v628_v62, %v626_v53  ;;  %vm542_vm10 = vcmp.eq.f32.partialorder %v541_v55, 8.507059e+37 }
  0x8d   : > { %v502_v36 = vadd.f32 1e-12, %v501_v31  ;;  %v597_v20 = vadd.f32 %v596_v6, %v589_v45 }
  0x8e   : > { %v630_v21 = vadd.f32 %v629_v7, %v622_v46 }
  0x8f   : > { %v997_v37 = vpop.eup %996  ;;  %v515_v38 = vmul.f32 %v512_v32, %v502_v36 }
  0x90   : > { %v533_v41 = vmul.f32 %v997_v37, %v531_v26  ;;  %vm538_vm4 = vweird.f32 %v997_v37  ;;  %v625_v26 = vmul.f32 %v624_v17, %v1512_v14 }
  0x91   : > { %998 = vrcp.f32 %v515_v38  ;;  %vm521_vm5 = vweird.f32 %v515_v38  ;;  %v527_v54 = vand.u32 2147483648, %v515_v38  ;;  %v525_v59 = vand.u32 2147483647, %v515_v38  ;;  %vm1526_vm7 = vmor %vm537_vm3, %vm538_vm4 }
  0x92   : > { %v534_v43 = vsub.f32 1.0, %v533_v41 }
  0x93   : > { %v528_v4 = vor.u32 1.1754944e-38, %v527_v54  ;;  %vm526_vm9 = vcmp.eq.f32.partialorder %v525_v59, 8.507059e+37 }
  0x94   : > { %v535_v47 = vmul.f32 %v997_v37, %v534_v43  ;;  %v636_v43 = vmul.f32 %v635_v34, %v625_v26 }
  0x96   : > { %v536_v60 = vadd.f32 %v997_v37, %v535_v47 }
  0x97   : > { %v999_v48 = vpop.eup %998 }
  0x98   : > { %v517_v52 = vmul.f32 %v999_v48, %v515_v38  ;;  %vm522_vm6 = vweird.f32 %v999_v48  ;;  %v540_v9 = vsel %vm1526_vm7, %v997_v37, %v536_v60  ;;  %v571_v38 = vmul.f32 %v570_v29, %v560_v24 }
  0x99   : > { %vm523_vm8 = vmor %vm521_vm5, %vm522_vm6  ;;  %v545_v12 = vsel %vm542_vm10, %v544_v5, %v540_v9 }
  0x9a   : > { %v518_v58 = vsub.f32 1.0, %v517_v52 }
  0x9c   : > { %v519_v1 = vmul.f32 %v999_v48, %v518_v58 }
  0x9e   : > { %v520_v8 = vadd.f32 %v999_v48, %v519_v1 }
  0xa0   : > { %v524_v10 = vsel %vm523_vm8, %v999_v48, %v520_v8 }
  0xa1   : > { %v529_v11 = vsel %vm526_vm9, %v528_v4, %v524_v10 }
  0xa2   : > { %v530_v18 = vmul.f32 %v529_v11, %v514_v0 }
  0xa4   : > { %v546_v22 = vmul.f32 %v545_v12, %v530_v18 }
  0xa6   : > { %v566_v31 = vmul.f32 %v565_v19, %v546_v22  ;;  %v598_v32 = vmul.f32 %v597_v20, %v546_v22  ;;  %v631_v33 = vmul.f32 %v630_v21, %v546_v22 }
  0xa8   : > { %v567_v35 = vmul.f32 %v566_v31, %v560_v24  ;;  %v599_v36 = vmul.f32 %v598_v32, %v592_v25  ;;  %v632_v37 = vmul.f32 %v631_v33, %v625_v26 }
  0xaa   : > { %v568_v40 = vmax.f32 %v567_v35, 1e-12  ;;  %v600_v41 = vmax.f32 %v599_v36, 1e-12  ;;  %v633_v42 = vmax.f32 %v632_v37, 1e-12 }
  0xac   : > { %v569_v44 = vmin.f32 %v568_v40, 1.0  ;;  %v601_v14 = vmin.f32 %v600_v41, 1.0  ;;  %v634_v45 = vmin.f32 %v633_v42, 1.0 }
  0xae   : > { %v572_v23 = vadd.f32 %v571_v38, %v569_v44  ;;  %v604_v46 = vadd.f32 %v603_v39, %v601_v14  ;;  %v637_v27 = vadd.f32 %v636_v43, %v634_v45 }
  0xb0   : > { %v573_v47 = vmin.f32 %v572_v23, 1.0  ;;  %v605_v48 = vmin.f32 %v604_v46, 1.0  ;;  %v638_v49 = vmin.f32 %v637_v27, 1.0 }
  0xb2   : > { %1000 = vlog2.f32 %v573_v47 }
  0xb3   : > { %1002 = vlog2.f32 %v605_v48 }
  0xb4   : > { %1004 = vlog2.f32 %v638_v49 }
  0xb8   : > { %v1001_v28 = vpop.eup %1000 }
  0xb9   : > { %v1003_v50 = vpop.eup %1002  ;;  %v575_v51 = vmul.f32 0.6931472, %v1001_v28 }
  0xba   : > { %v1005_v52 = vpop.eup %1004  ;;  %v607_v53 = vmul.f32 0.6931472, %v1003_v50 }
  0xbb   : > { %v576_v54 = vmul.f32 0.45454547, %v575_v51  ;;  %v640_v55 = vmul.f32 0.6931472, %v1005_v52 }
  0xbc   : > { %v608_v56 = vmul.f32 0.45454547, %v607_v53 }
  0xbd   : > { %v577_v57 = vmul.f32 1.442695, %v576_v54  ;;  %v641_v58 = vmul.f32 0.45454547, %v640_v55 }
  0xbe   : > { %v609_v59 = vmul.f32 1.442695, %v608_v56 }
  0xbf   : > { %1006 = vpow2.f32 %v577_v57  ;;  %v642_v60 = vmul.f32 1.442695, %v641_v58 }
  0xc0   : > { %1008 = vpow2.f32 %v609_v59 }
  0xc1   : > { %1010 = vpow2.f32 %v642_v60 }
  0xc5   : > { %v1007_v61 = vpop.eup %1006 }
  0xc6   : > { %v1009_v62 = vpop.eup %1008  ;;  %579 = vst [vmem:[%s419_s19] sm:$0xff] %v1007_v61 }
  0xc7   : > { %v1011_v63 = vpop.eup %1010  ;;  %856 = vst [vmem:[%s419_s19 + $0x8] sm:$0xff] %v1009_v62 }
  0xc8   : > { %859 = vst [vmem:[%s419_s19 + $0x10] sm:$0xff] %v1011_v63 }
  0xc9   : > { %1189 = shalt.err (!%p1186_p3)
}
  0xca   : > { %s1281_s13 = smov 128   ;;  %s1282_s1 = smov 8  }
  0xcb   : > { %880 = dma.vmem_to_hbm [thread:$0]  (%p1421_p9), %s661_s2, 384, %s663_s16, %s647_s28, %s1281_s13, %s1281_s13, %s1282_s1  }
  0xcc PF: > { %s1625_s12 = sld [smem:[#allocation20_spill]]  ;;  %p900_p5 = pnand %p835_p13, %p1377_p8 }
  0xce   : > { %p901_p7 = pneg %p900_p5 }
  0xd2   : > { %s677_s17 = sand.u32 1, %s1625_s12  }
  0xd3   : > { %s678_s18 = scalar_lea.sflag [#allocation6], %s677_s17 }
  0xd4   : > { %1243 = dma.done.wait (%p901_p7), %s678_s18, 384  }
  0xd5   : > { %1245 = vsyncadd (%p901_p7), %s678_s18, 4294966912  ;;  %s29_s29 = sadd.s32 1, %s1276_s29   ;;  %s1627_s23 = sld [smem:[#allocation19_spill]] }
  0xd6   : > { %p26_p12 = scmp.ge.s32.totalorder %s29_s29, 4   ;;  %s1628_s22 = sld [smem:[#allocation21_spill]] }
  0xd7   : > { %s1629_s27 = sld [smem:[#allocation24_spill]]  ;;  %s1564_s24 = smov 0  }
  0xd8   : > { %s1630_s20 = sld [smem:[#allocation23_spill]]  ;;  %s1631_s25 = smov %s1260_s26 }
  0xd9   : > { %s1633_s28 = smov %s1272_s0 }
  0xda   :  { %28 = sbr.rel (!%p26_p12) target bundleno = 16 (0x10), region = 144 }
  0xdc   : > { %s1632_s26 = smov %s1628_s22 }
  0xde   : > { %s1634_s0 = smov %s1630_s20 }
  0xdf   :  { %684 = vsyncpa [#allocation5], 1 }
  0xe0   :  { %686 = vsyncpa [#allocation5 + $0x1], 1 }
  0xe1   :  { %687 = vsyncpa [#allocation8], 1 }
  0xe2   :  { %689 = vsyncpa [#allocation8 + $0x1], 1 }
  0xe3   :  { %690 = vsyncpa [#allocation11], 1 }
  0xe4   :  { %692 = vsyncpa [#allocation11 + $0x1], 1 }
  0xe5   :  { %693 = vsyncpa [#allocation6], 1 }
  0xe6   :  { %695 = vsyncpa [#allocation6 + $0x1], 1 }

</bundles_post_ra>
